<compile_context>
chip_gen: v6e
topology: v6e:2x2x1
jax: 0.10.0
libtpu: 0.0.40
codegen_flags: <defaults>
</compile_context>

<pallas_src>
import functools

import jax
import jax.numpy as jnp
from jax.experimental import pallas as pl
from jax.experimental.pallas import tpu as pltpu

C_IN, C_MID, C_OUT = 256, 128, 10
C_OUT_PAD = 128            # lane-dense padded output channels (10 -> 128)
BN_EPS = 1e-5
LEAKY_SLOPE = 0.2
VMEM_LIMIT = 32 * 1024 * 1024   # explicit scoped-VMEM budget (safe on v5e/v6e/v7x)


def _stats_kernel(x_ref, w1_ref, sum_ref, sumsq_ref):
    """Phase 0: accumulate per-channel sum / sum-of-squares of h = x @ w1 (f32)."""
    i = pl.program_id(0)

    @pl.when(i == 0)
    def _():
        sum_ref[...] = jnp.zeros_like(sum_ref)
        sumsq_ref[...] = jnp.zeros_like(sumsq_ref)

    # bf16 MXU matmul, f32 accumulation; BN statistics stay in f32.
    h = jnp.dot(x_ref[...], w1_ref[...], preferred_element_type=jnp.float32)
    sum_ref[...] += jnp.sum(h, axis=0, keepdims=True)
    sumsq_ref[...] += jnp.sum(h * h, axis=0, keepdims=True)


def _apply_kernel(x_ref, w1_ref, sum_ref, sumsq_ref, gamma_ref, beta_ref,
                  w2_ref, b2_ref, out_ref, *, inv_m):
    """Phase 1: recompute h, apply folded BN scale/shift, LeakyReLU, conv2."""
    h = jnp.dot(x_ref[...], w1_ref[...], preferred_element_type=jnp.float32)

    mean = sum_ref[...] * inv_m                          # (1, 128) f32
    var = sumsq_ref[...] * inv_m - mean * mean           # biased (train-mode) variance
    scale = gamma_ref[...] * jax.lax.rsqrt(var + BN_EPS)  # fold BN into scale/shift
    shift = beta_ref[...] - mean * scale

    h_bn = h * scale + shift
    act = jnp.maximum(h_bn, LEAKY_SLOPE * h_bn)          # LeakyReLU(0.2)

    out = jnp.dot(act.astype(jnp.bfloat16), w2_ref[...],
                  preferred_element_type=jnp.float32) + b2_ref[...]
    out_ref[...] = out.astype(out_ref.dtype)


def _choose_tile_m(m):
    # Big tiles hide DMA behind MXU work; 2048 rows (bf16) is ~1 MiB per x buffer,
    # ~1 MiB per out buffer -> comfortably inside v7x's 64 MiB VMEM even double-buffered.
    if m >= 2048:
        return 2048
    return max(8, ((m + 7) // 8) * 8)


def qhead_forward(x_nchw, params, *, tile_m=None):
    """x_nchw: (N, 256, H, W) float32 -> logits with PyTorch .squeeze() semantics."""
    N, C, H, W = x_nchw.shape
    assert C == C_IN
    M = N * H * W
    if tile_m is None:
        tile_m = _choose_tile_m(M)
    assert tile_m % 8 == 0
    num_tiles = (M + tile_m - 1) // tile_m
    m_pad = num_tiles * tile_m

    # NCHW -> NHWC -> (M, C_in) rows; bf16 halves the dominant HBM read.
    x_rows = jnp.transpose(x_nchw, (0, 2, 3, 1)).reshape(M, C).astype(jnp.bfloat16)
    if m_pad != M:
        # Zero rows contribute 0 to sum / sumsq, so BN stats stay exact (we divide by true M).
        x_rows = jnp.pad(x_rows, ((0, m_pad - M), (0, 0)))

    w1 = params["w1"].astype(jnp.bfloat16)                       # (256, 128)
    gamma = params["gamma"].astype(jnp.float32)                  # (1, 128)
    beta = params["beta"].astype(jnp.float32)                    # (1, 128)
    # Lane-dense conv2: zero-pad output channels 10 -> 128 for unmasked stores.
    w2p = jnp.zeros((C_MID, C_OUT_PAD), jnp.bfloat16).at[:, :C_OUT].set(
        params["w2"].astype(jnp.bfloat16))
    b2p = jnp.zeros((1, C_OUT_PAD), jnp.float32).at[:, :C_OUT].set(
        params["b2"].astype(jnp.float32))

    def resident(shape):
        # Constant block index -> DMA'd once, stays resident across all grid steps.
        return pl.BlockSpec(shape, lambda i: (0, 0))

    # ---------------- Pass 1: batch statistics ----------------
    stats_cost = pl.CostEstimate(
        flops=2 * m_pad * C_IN * C_MID + 4 * m_pad * C_MID,
        transcendentals=0,
        bytes_accessed=m_pad * C_IN * 2 + C_IN * C_MID * 2 + 2 * C_MID * 4,
    )
    h_sum, h_sumsq = pl.pallas_call(
        _stats_kernel,
        out_shape=(jax.ShapeDtypeStruct((1, C_MID), jnp.float32),
                   jax.ShapeDtypeStruct((1, C_MID), jnp.float32)),
        grid=(num_tiles,),
        in_specs=[
            pl.BlockSpec((tile_m, C_IN), lambda i: (i, 0)),
            resident((C_IN, C_MID)),
        ],
        out_specs=(resident((1, C_MID)), resident((1, C_MID))),
        compiler_params=pltpu.CompilerParams(
            dimension_semantics=("arbitrary",),      # reduction over M tiles
            vmem_limit_bytes=VMEM_LIMIT),
        cost_estimate=stats_cost,
    )(x_rows, w1)

    # ---------------- Pass 2: normalize + LeakyReLU + conv2 ----------------
    inv_m = 1.0 / float(M)
    apply_cost = pl.CostEstimate(
        flops=(2 * m_pad * C_IN * C_MID + 2 * m_pad * C_MID * C_OUT_PAD
               + 4 * m_pad * C_MID),
        transcendentals=num_tiles * C_MID,
        bytes_accessed=(m_pad * C_IN * 2 + m_pad * C_OUT_PAD * 4
                        + C_IN * C_MID * 2 + C_MID * C_OUT_PAD * 2),
    )
    out_rows = pl.pallas_call(
        functools.partial(_apply_kernel, inv_m=inv_m),
        out_shape=jax.ShapeDtypeStruct((m_pad, C_OUT_PAD), jnp.float32),
        grid=(num_tiles,),
        in_specs=[
            pl.BlockSpec((tile_m, C_IN), lambda i: (i, 0)),
            resident((C_IN, C_MID)),
            resident((1, C_MID)),        # sum(h)
            resident((1, C_MID)),        # sum(h*h)
            resident((1, C_MID)),        # gamma
            resident((1, C_MID)),        # beta
            resident((C_MID, C_OUT_PAD)),
            resident((1, C_OUT_PAD)),
        ],
        out_specs=pl.BlockSpec((tile_m, C_OUT_PAD), lambda i: (i, 0)),
        compiler_params=pltpu.CompilerParams(
            dimension_semantics=("parallel",),       # independent tiles -> megacore on v7x
            vmem_limit_bytes=VMEM_LIMIT),
        cost_estimate=apply_cost,
    )(x_rows, w1, h_sum, h_sumsq, gamma, beta, w2p, b2p)

    # (M_pad, 128) -> (M, 10) -> (N, H, W, 10) -> NCHW -> .squeeze()
    logits_rows = out_rows[:M, :C_OUT]
    logits_nchw = jnp.transpose(logits_rows.reshape(N, H, W, C_OUT), (0, 3, 1, 2))
    return jnp.squeeze(logits_nchw)


def init_params(key):
    k1, k2, k3 = jax.random.split(key, 3)
    # conv1.weight: (128, 256, 1, 1) -> stored transposed as (256, 128)
    w1 = jax.random.normal(k1, (C_IN, C_MID), jnp.float32) * 0.02
    # bn1: gamma=1, beta=0 (PyTorch default init)
    gamma = jnp.ones((1, C_MID), jnp.float32)
    beta = jnp.zeros((1, C_MID), jnp.float32)
    # conv2.weight: (10, 128, 1, 1) -> stored transposed as (128, 10); bias (10,)
    w2 = jax.random.normal(k2, (C_MID, C_OUT), jnp.float32) * 0.05
    b2 = jax.random.normal(k3, (1, C_OUT), jnp.float32) * 0.01
    return {"w1": w1, "gamma": gamma, "beta": beta, "w2": w2, "b2": b2}


def qhead_reference(x_nchw, params):
    """Pure-JAX f32 reference (same math as the PyTorch module, no Pallas)."""
    N, C, H, W = x_nchw.shape
    x_rows = jnp.transpose(x_nchw, (0, 2, 3, 1)).reshape(N * H * W, C)
    h = x_rows @ params["w1"]
    mean = jnp.mean(h, axis=0, keepdims=True)
    var = jnp.mean((h - mean) ** 2, axis=0, keepdims=True)   # biased, train-mode
    h_bn = (h - mean) / jnp.sqrt(var + BN_EPS) * params["gamma"] + params["beta"]
    act = jnp.where(h_bn > 0, h_bn, LEAKY_SLOPE * h_bn)
    out = act @ params["w2"] + params["b2"]
    return jnp.squeeze(jnp.transpose(out.reshape(N, H, W, C_OUT), (0, 3, 1, 2)))


if __name__ == "__main__":
    key = jax.random.PRNGKey(0)
    kx, kp, kx2 = jax.random.split(key, 3)
    params = init_params(kp)

    # Case 1: canonical Qhead input (N, 256, 1, 1) -> squeeze -> (N, 10).
    N, H, W = 8, 1, 1
    x = jax.random.normal(kx, (N, C_IN, H, W), jnp.float32)
    out = jax.block_until_ready(qhead_forward(x, params))
    ref = qhead_reference(x, params)
    assert out.shape == ref.shape == (N, C_OUT), (out.shape, ref.shape)
    # bf16 matmul operands (f32 accumulation / f32 BN math) -> loosened tolerance.
    assert jnp.allclose(out, ref, atol=3e-2, rtol=3e-2), float(jnp.max(jnp.abs(out - ref)))

    # Case 2: spatial input with a multi-tile grid (exercises streaming BN accumulation).
    x2 = jax.random.normal(kx2, (2, C_IN, 4, 4), jnp.float32)
    out2 = jax.block_until_ready(qhead_forward(x2, params, tile_m=16))
    ref2 = qhead_reference(x2, params)
    assert out2.shape == ref2.shape == (2, C_OUT, 4, 4), (out2.shape, ref2.shape)
    assert jnp.allclose(out2, ref2, atol=3e-2, rtol=3e-2), float(jnp.max(jnp.abs(out2 - ref2)))

    print("KERNEL_OK")
</pallas_src>

<mosaic_0001>
module attributes {stable_mosaic.version = 11 : i64} {
  func.func @_stats_kernel(%arg0: i32, %arg1: memref<8x256xbf16, #tpu.memory_space<vmem>>, %arg2: memref<256x128xbf16, #tpu.memory_space<vmem>>, %arg3: memref<1x128xf32, #tpu.memory_space<vmem>>, %arg4: memref<1x128xf32, #tpu.memory_space<vmem>>) attributes {dimension_semantics = [#tpu.dimension_semantics<arbitrary>], iteration_bounds = array<i64: 1>, scalar_prefetch = 0 : i64, scratch_operands = 0 : i64, tpu.core_type = #tpu.core_type<tc>, window_params = [{transform_indices = @transform_0, window_bounds = array<i64: 8, 256>}, {pipeline_mode = #tpu.pipeline_mode<synchronous>, transform_indices = @transform_1, window_bounds = array<i64: 256, 128>}, {pipeline_mode = #tpu.pipeline_mode<synchronous>, transform_indices = @transform_2, window_bounds = array<i64: 1, 128>}, {pipeline_mode = #tpu.pipeline_mode<synchronous>, transform_indices = @transform_3, window_bounds = array<i64: 1, 128>}]} {
    %c0_i32 = arith.constant 0 : i32
    %0 = arith.cmpi eq, %arg0, %c0_i32 : i32
    %1 = arith.extui %0 : i1 to i32
    %c0_i32_0 = arith.constant 0 : i32
    %2 = arith.cmpi ne, %1, %c0_i32_0 : i32
    scf.if %2 {
      %cst_14 = arith.constant 0.000000e+00 : f32
      %17 = vector.broadcast %cst_14 : f32 to vector<1x128xf32>
      %c0_15 = arith.constant 0 : index
      %c0_16 = arith.constant 0 : index
      %18 = vector.load %arg3[%c0_15, %c0_16] : memref<1x128xf32, #tpu.memory_space<vmem>>, vector<1x128xf32>
      tpu.vector_store %arg3[%c0_15, %c0_16], %17 {strides = array<i32>} : memref<1x128xf32, #tpu.memory_space<vmem>>, vector<1x128xf32>,
      %cst_17 = arith.constant 0.000000e+00 : f32
      %19 = vector.broadcast %cst_17 : f32 to vector<1x128xf32>
      %c0_18 = arith.constant 0 : index
      %c0_19 = arith.constant 0 : index
      %20 = vector.load %arg4[%c0_18, %c0_19] : memref<1x128xf32, #tpu.memory_space<vmem>>, vector<1x128xf32>
      tpu.vector_store %arg4[%c0_18, %c0_19], %19 {strides = array<i32>} : memref<1x128xf32, #tpu.memory_space<vmem>>, vector<1x128xf32>,
    } else {
    }
    %c0 = arith.constant 0 : index
    %c0_1 = arith.constant 0 : index
    %3 = vector.load %arg1[%c0, %c0_1] : memref<8x256xbf16, #tpu.memory_space<vmem>>, vector<8x256xbf16>
    %c0_2 = arith.constant 0 : index
    %c0_3 = arith.constant 0 : index
    %4 = vector.load %arg2[%c0_2, %c0_3] : memref<256x128xbf16, #tpu.memory_space<vmem>>, vector<256x128xbf16>
    %cst = arith.constant dense<0.000000e+00> : vector<8x128xf32>
    %5 = tpu.matmul %3, %4, %cst {dimension_numbers = #tpu.dot_dimension_numbers<[1], [0], [0], [1], [0, 0, 1, 1], [], []>} : vector<8x256xbf16>, vector<256x128xbf16>, vector<8x128xf32> -> vector<8x128xf32>
    %c0_4 = arith.constant 0 : index
    %c0_5 = arith.constant 0 : index
    %6 = vector.load %arg3[%c0_4, %c0_5] : memref<1x128xf32, #tpu.memory_space<vmem>>, vector<1x128xf32>
    %cst_6 = arith.constant dense<0.000000e+00> : vector<128xf32>
    %7 = vector.multi_reduction <add>, %5, %cst_6 [0] : vector<8x128xf32> to vector<128xf32>
    %8 = vector.shape_cast %7 : vector<128xf32> to vector<1x128xf32>
    %9 = arith.addf %6, %8 : vector<1x128xf32>
    %c0_7 = arith.constant 0 : index
    %c0_8 = arith.constant 0 : index
    %10 = vector.load %arg3[%c0_7, %c0_8] : memref<1x128xf32, #tpu.memory_space<vmem>>, vector<1x128xf32>
    tpu.vector_store %arg3[%c0_7, %c0_8], %9 {strides = array<i32>} : memref<1x128xf32, #tpu.memory_space<vmem>>, vector<1x128xf32>,
    %c0_9 = arith.constant 0 : index
    %c0_10 = arith.constant 0 : index
    %11 = vector.load %arg4[%c0_9, %c0_10] : memref<1x128xf32, #tpu.memory_space<vmem>>, vector<1x128xf32>
    %12 = arith.mulf %5, %5 : vector<8x128xf32>
    %cst_11 = arith.constant dense<0.000000e+00> : vector<128xf32>
    %13 = vector.multi_reduction <add>, %12, %cst_11 [0] : vector<8x128xf32> to vector<128xf32>
    %14 = vector.shape_cast %13 : vector<128xf32> to vector<1x128xf32>
    %15 = arith.addf %11, %14 : vector<1x128xf32>
    %c0_12 = arith.constant 0 : index
    %c0_13 = arith.constant 0 : index
    %16 = vector.load %arg4[%c0_12, %c0_13] : memref<1x128xf32, #tpu.memory_space<vmem>>, vector<1x128xf32>
    tpu.vector_store %arg4[%c0_12, %c0_13], %15 {strides = array<i32>} : memref<1x128xf32, #tpu.memory_space<vmem>>, vector<1x128xf32>,
    return
  }
  func.func @transform_0(%arg0: i32) -> (i32, i32) {
    %c0_i32 = arith.constant 0 : i32
    %c0_i32_0 = arith.constant 0 : i32
    return %arg0, %c0_i32 : i32, i32
  }
  func.func @transform_1(%arg0: i32) -> (i32, i32) {
    %c0_i32 = arith.constant 0 : i32
    %c0_i32_0 = arith.constant 0 : i32
    %c0_i32_1 = arith.constant 0 : i32
    return %c0_i32, %c0_i32_0 : i32, i32
  }
  func.func @transform_2(%arg0: i32) -> (i32, i32) {
    %c0_i32 = arith.constant 0 : i32
    %c0_i32_0 = arith.constant 0 : i32
    %c0_i32_1 = arith.constant 0 : i32
    return %c0_i32, %c0_i32_0 : i32, i32
  }
  func.func @transform_3(%arg0: i32) -> (i32, i32) {
    %c0_i32 = arith.constant 0 : i32
    %c0_i32_0 = arith.constant 0 : i32
    %c0_i32_1 = arith.constant 0 : i32
    return %c0_i32, %c0_i32_0 : i32, i32
  }
}

</mosaic_0001>

<bundles_post_ra>
// kernel: tpu_custom_call.1
= control target key start
LH: loop header
LB: loop body
LE: loop exit
PB: predicated region body
PF: predicated region fallthrough
CT: control target
= control target key end

     0   :  { %9 = vsyncpa [#allocation3], 0  ;;  %s465_s0 = inlined_call_operand.hbm [shape: bf16[8,256], index: 0, kind: input, shape index: {}]   ;;  %s466_s1 = inlined_call_operand.hbm [shape: bf16[256,128], index: 1, kind: input, shape index: {}]   ;;  %s467_s2 = inlined_call_operand.hbm [shape: f32[1,128], index: 2, kind: output, shape index: {0}]   ;;  %s468_s3 = inlined_call_operand.hbm [shape: f32[1,128], index: 3, kind: output, shape index: {1}]  }
   0x1   :  { %10 = vsyncpa [#allocation6], 0 }
   0x2   :  { %11 = vsyncpa [#allocation4], 0 }
   0x3   :  { %12 = vsyncpa [#allocation9], 0  ;;  %s426_s12 = smov [#allocation2]   ;;  %s427_s14 = smov [#allocation5]  }
   0x4   :  { %s19_s13 = sshll.u32 %s426_s12, 4  ;;  %s28_s15 = sshll.u32 %s427_s14, 4  ;;  %s20_s13 = int_to_ptr.vmem [resolvable:$true] %s19_s13  ;;  %s29_s15 = int_to_ptr.vmem [resolvable:$true] %s28_s15 }
   0x5   :  { %s346_s16 = scalar_lea.vmem %s20_s13, 128  ;;  %p351_p1 = scmp.lt.s32.totalorder %s20_s13, %s20_s13 }
   0x6   :  { %p347_p0 = scmp.ne.s32.totalorder %s20_s13, %s346_s16  ;;  %p352_p2 = scmp.lt.s32.totalorder %s346_s16, %s346_s16 }
   0x8   :  { %p353_p3 = por %p352_p2, %p351_p1 }
   0xa   :  { %p354_p4 = pnand %p353_p3, %p347_p0 }
   0xc   :  { %357 = shalt.err (!%p354_p4)
}
   0xd   :  { %22 = dma.hbm_to_vmem [thread:$0]  %s465_s0, 128, %s20_s13, [#allocation3]  }
   0xe   :  { %s366_s19 = scalar_lea.vmem %s29_s15, 2048  ;;  %p371_p6 = scmp.lt.s32.totalorder %s29_s15, %s29_s15 }
   0xf   :  { %p367_p5 = scmp.ne.s32.totalorder %s29_s15, %s366_s19  ;;  %p372_p7 = scmp.lt.s32.totalorder %s366_s19, %s366_s19 }
  0x11   :  { %p373_p8 = por %p372_p7, %p371_p6 }
  0x13   :  { %p374_p9 = pnand %p373_p8, %p367_p5 }
  0x15   :  { %377 = shalt.err (!%p374_p9)
}
  0x16   :  { %s428_s20 = smov 64   ;;  %s429_s21 = smov 4  }
  0x17   :  { %34 = dma.hbm_to_vmem [thread:$0]  %s466_s1, 2048, %s29_s15, [#allocation6], %s428_s20, %s428_s20, %s429_s21  }
  0x18   :  { %418 = dma.done.wait [#allocation3], 128  }
  0x19   :  { %419 = vsyncadd [#allocation3], 4294967168 }
  0x1a   :  { %420 = dma.done.wait [#allocation6], 2048  }
  0x1b   :  { %421 = vsyncadd [#allocation6], 4294965248  ;;  %v320_v0 = vld [vmem:[#allocation5 + $0x78] sm:$0xff]   ;;  %v322_v2 = vld [vmem:[#allocation5 + $0x70] sm:$0xff]   ;;  %v430_v19 = vmov 0.0   ;;  %s431_s0 = smov [#allocation7]  }
  0x1c   :  { %v321_v1 = vld [vmem:[#allocation5 + $0x38] sm:$0xff]   ;;  %291 = vmatprep.subr.bf16.mxu0 %v320_v0  ;;  %v323_v3 = vld [vmem:[#allocation5 + $0x30] sm:$0xff]   ;;  %v324_v4 = vld [vmem:[#allocation5 + $0x68] sm:$0xff]   ;;  %46 = vst [vmem:[#allocation7] sm:$0x1] %v430_v19  ;;  %s249_s1 = sshll.u32 %s431_s0, 4  ;;  %s250_s1 = int_to_ptr.vmem [resolvable:$true] %s249_s1 }
  0x1d   :  { %292 = vmatpush3.bf16.msra.mxu0 %v321_v1  ;;  %v325_v5 = vld [vmem:[#allocation5 + $0x28] sm:$0xff]   ;;  %v326_v6 = vld [vmem:[#allocation5 + $0x60] sm:$0xff]   ;;  %v328_v8 = vld [vmem:[#allocation5 + $0x58] sm:$0xff]   ;;  %47 = vst [vmem:[#allocation8] sm:$0x1] %v430_v19  ;;  %s432_s24 = smov [#allocation8]   ;;  %p383_p11 = scmp.lt.s32.totalorder %s250_s1, %s250_s1 }
  0x1e   :  { %293 = vmatprep.subr.bf16.mxu0 %v322_v2  ;;  %v327_v7 = vld [vmem:[#allocation5 + $0x20] sm:$0xff]   ;;  %v329_v9 = vld [vmem:[#allocation5 + $0x18] sm:$0xff]   ;;  %v330_v10 = vld [vmem:[#allocation5 + $0x50] sm:$0xff]   ;;  %s259_s25 = sshll.u32 %s432_s24, 4  ;;  %s378_s26 = scalar_lea.vmem %s250_s1, 16  ;;  %s260_s25 = int_to_ptr.vmem [resolvable:$true] %s259_s25 }
  0x1f   :  { %v48_v11 = vld [vmem:[#allocation2] sm:$0xff]  ;;  %v331_v13 = vld [vmem:[#allocation5 + $0x10] sm:$0xff]   ;;  %v332_v14 = vld [vmem:[#allocation5 + $0x48] sm:$0xff]   ;;  %p379_p10 = scmp.ne.s32.totalorder %s250_s1, %s378_s26  ;;  %s382_s27 = scalar_lea.vmem %s250_s1, 32 }
  0x20   :  { %v274_v12 = vcombine.high %v48_v11, %v48_v11  ;;  %v333_v15 = vld [vmem:[#allocation5 + $0x8] sm:$0xff]   ;;  %v334_v16 = vld [vmem:[#allocation5 + $0x40] sm:$0xff]   ;;  %v273_v18 = vcombine.low %v48_v11, %v48_v11  ;;  %p384_p12 = scmp.lt.s32.totalorder %s382_s27, %s378_s26 }
  0x21   :  { %294 = vmatpush3.bf16.msra.mxu0 %v323_v3  ;;  %v335_v17 = vld [vmem:[#allocation5] sm:$0xff]  }
  0x22   :  { %295 = vmatprep.subr.bf16.mxu0 %v324_v4  ;;  %216 = vmatprep.mubr.bf16.mxu0 %v274_v12  ;;  %p385_p13 = por %p384_p12, %p383_p11 }
  0x23   :  { %v224_v35 = vld [vmem:[#allocation7] sm:$0x1] }
  0x24   :  { %v233_v38 = vld [vmem:[#allocation8] sm:$0x1]  ;;  %p386_p0 = pnand %p385_p13, %p379_p10 }
  0x25   :  { %296 = vmatpush3.bf16.msra.mxu0 %v325_v5 }
  0x26   :  { %297 = vmatprep.subr.bf16.mxu0 %v326_v6 }
  0x29   :  { %298 = vmatpush3.bf16.msra.mxu0 %v327_v7 }
  0x2a   :  { %299 = vmatprep.subr.bf16.mxu0 %v328_v8 }
  0x2d   :  { %300 = vmatpush3.bf16.msra.mxu0 %v329_v9 }
  0x2e   :  { %301 = vmatprep.subr.bf16.mxu0 %v330_v10 }
  0x31   :  { %302 = vmatpush3.bf16.msra.mxu0 %v331_v13 }
  0x32   :  { %303 = vmatprep.subr.bf16.mxu0 %v332_v14 }
  0x35   :  { %304 = vmatpush3.bf16.msra.mxu0 %v333_v15 }
  0x36   :  { %305 = vmatprep.subr.bf16.mxu0 %v334_v16 }
  0x39   :  { %306 = vmatpush3.bf16.msra.mxu0 %v335_v17 }
  0x3c   :  { %217 = vmatmul.mubr.bf16.vlgmr.msra.gmra.mxu0 %v273_v18 }
  0xfc   :  { %v307_v20 = vpop.f32.mrf.mxu0 }
  0xfe   :  { %v308_v21 = vpop.f32.mrf.mxu0 }
  0xff   :  { %v309_v22 = vadd.f32 %v308_v21, %v307_v20 }
 0x100   :  { %v310_v23 = vpop.f32.mrf.mxu0 }
 0x101   :  { %v225_v24 = vrot.slane %v309_v22, 4  ;;  %v234_v25 = vmul.f32 %v309_v22, %v309_v22 }
 0x102   :  { %v311_v26 = vpop.f32.mrf.mxu0 }
 0x103   :  { %v226_v27 = vadd.f32 %v309_v22, %v225_v24  ;;  %v235_v28 = vrot.slane %v234_v25, 4 }
 0x105   :  { %v227_v29 = vrot.slane %v226_v27, 2  ;;  %v236_v30 = vadd.f32 %v235_v28, %v234_v25 }
 0x107   :  { %v228_v31 = vadd.f32 %v227_v29, %v226_v27  ;;  %v237_v32 = vrot.slane %v236_v30, 2 }
 0x109   :  { %v229_v33 = vrot.slane %v228_v31, 1  ;;  %v238_v34 = vadd.f32 %v237_v32, %v236_v30 }
 0x10b   :  { %v230_v36 = vadd.f32 %v229_v33, %v228_v31  ;;  %v239_v37 = vrot.slane %v238_v34, 1 }
 0x10d   :  { %v231_v39 = vadd.f32 %v230_v36, %v224_v35  ;;  %v240_v40 = vadd.f32 %v239_v37, %v238_v34 }
 0x10f   :  { %232 = vst [vmem:[#allocation7] sm:$0x1] %v231_v39  ;;  %v241_v41 = vadd.f32 %v240_v40, %v233_v38 }
 0x110   :  { %389 = shalt.err (!%p386_p0)
}
 0x111   :  { %252 = dma.vmem_to_hbm [thread:$0]  %s250_s1, 16, %s467_s2, [#allocation4]   ;;  %242 = vst [vmem:[#allocation8] sm:$0x1] %v241_v41 }
 0x112   :  { %s398_s30 = scalar_lea.vmem %s260_s25, 16  ;;  %s402_s4 = scalar_lea.vmem %s260_s25, 32 }
 0x113   :  { %p399_p1 = scmp.ne.s32.totalorder %s260_s25, %s398_s30  ;;  %p403_p2 = scmp.lt.s32.totalorder %s260_s25, %s260_s25 }
 0x114   :  { %p404_p3 = scmp.lt.s32.totalorder %s402_s4, %s398_s30 }
 0x116   :  { %p405_p4 = por %p404_p3, %p403_p2 }
 0x118   :  { %p406_p5 = pnand %p405_p4, %p399_p1 }
 0x11a   :  { %409 = shalt.err (!%p406_p5)
}
 0x11b   :  { %262 = dma.vmem_to_hbm [thread:$0]  %s260_s25, 16, %s468_s3, [#allocation9]  }
 0x11c   :  { %422 = dma.done.wait [#allocation4], 16  }
 0x11d   :  { %423 = vsyncadd [#allocation4], 4294967280 }
 0x11e   :  { %424 = dma.done.wait [#allocation9], 16  }
 0x11f   :  { %425 = vsyncadd [#allocation9], 4294967280 }
 0x120   :  { %269 = vsyncpa [#allocation3], 1 }
 0x121   :  { %270 = vsyncpa [#allocation6], 1 }
 0x122   :  { %271 = vsyncpa [#allocation4], 1 }
 0x123   :  { %272 = vsyncpa [#allocation9], 1 }

</bundles_post_ra>
